<compile_context>
chip_gen: v6e
topology: v6e:2x2x1
jax: 0.10.0
libtpu: 0.0.40
codegen_flags: <defaults>
</compile_context>

<pallas_src>
import functools

import jax
import jax.numpy as jnp
from jax.experimental import pallas as pl
from jax.experimental.pallas import tpu as pltpu


def _meta_model_kernel(x_ref, w1_ref, b1_ref, w2_ref, b2_ref, o_ref):
    # x_ref:  (TB, input_dim)       VMEM, f32
    # w1_ref: (input_dim, hidden)   VMEM, bf16
    # b1_ref: (1, hidden)           VMEM, f32
    # w2_ref: (hidden, hidden)      VMEM, bf16
    # b2_ref: (1, hidden)           VMEM, f32
    # o_ref:  (TB, hidden)          VMEM, f32 or bf16
    x = x_ref[...]

    # Linear 1: bf16 MXU matmul, f32 accumulate; bias add + ReLU in f32 (VPU).
    h = jnp.dot(x.astype(w1_ref.dtype), w1_ref[...],
                preferred_element_type=jnp.float32)
    h = h + b1_ref[...]
    h = jnp.maximum(h, 0.0)

    # Dropout(p=0.5): identity in eval mode.

    # Linear 2: bf16 MXU matmul, f32 accumulate; bias add in f32.
    y = jnp.dot(h.astype(w2_ref.dtype), w2_ref[...],
                preferred_element_type=jnp.float32)
    y = y + b2_ref[...]

    # Final Dropout(p=0.5): identity in eval mode.
    o_ref[...] = y.astype(o_ref.dtype)


@functools.partial(jax.jit, static_argnames=("block_b", "out_dtype"))
def meta_model_forward(x, w1, b1, w2, b2, *, block_b=2048, out_dtype=None):
    """Fused forward pass of MetaModel.

    x:  (B, input_dim) float32
    w1: (input_dim, hidden) float32  (already transposed vs. torch's (out,in))
    b1: (hidden,) float32
    w2: (hidden, hidden) float32
    b2: (hidden,) float32
    out_dtype: output dtype; None -> x.dtype (f32 torch parity). bf16 halves
               output writeback bytes on this HBM-bound kernel if downstream
               accepts it.
    returns (B, hidden) out_dtype
    """
    B, input_dim = x.shape
    hidden = w1.shape[1]
    out_dtype = x.dtype if out_dtype is None else out_dtype

    # bf16 matmul operands, f32 biases / accumulation.  x is cast IN-KERNEL
    # (a wrapper-side astype would be a separate un-fused HBM pass).
    w1c = w1.astype(jnp.bfloat16)
    w2c = w2.astype(jnp.bfloat16)
    b1_2d = b1.reshape(1, hidden).astype(jnp.float32)
    b2_2d = b2.reshape(1, hidden).astype(jnp.float32)

    if B <= block_b:
        # Tiny/moderate batch: single kernel invocation, no grid, whole arrays
        # resident in VMEM.  Avoids all per-grid-step pipelining overhead.
        return pl.pallas_call(
            _meta_model_kernel,
            out_shape=jax.ShapeDtypeStruct((B, hidden), out_dtype),
            in_specs=[
                pl.BlockSpec(memory_space=pltpu.MemorySpace.VMEM),
                pl.BlockSpec(memory_space=pltpu.MemorySpace.VMEM),
                pl.BlockSpec(memory_space=pltpu.MemorySpace.VMEM),
                pl.BlockSpec(memory_space=pltpu.MemorySpace.VMEM),
                pl.BlockSpec(memory_space=pltpu.MemorySpace.VMEM),
            ],
            out_specs=pl.BlockSpec(memory_space=pltpu.MemorySpace.VMEM),
        )(x, w1c, b1_2d, w2c, b2_2d)

    # Large batch: tile rows with a big tile (amortizes the ~0.35 us fixed
    # per-grid-step cost; mem-bound regime), keep weights/biases VMEM-resident
    # across the batch loop (constant index_maps -> DMA'd once), and let the
    # batch axis be split across TensorCores where available.
    grid = (pl.cdiv(B, block_b),)
    return pl.pallas_call(
        _meta_model_kernel,
        out_shape=jax.ShapeDtypeStruct((B, hidden), out_dtype),
        grid=grid,
        in_specs=[
            pl.BlockSpec((block_b, input_dim), lambda i: (i, 0)),
            pl.BlockSpec((input_dim, hidden), lambda i: (0, 0)),
            pl.BlockSpec((1, hidden), lambda i: (0, 0)),
            pl.BlockSpec((hidden, hidden), lambda i: (0, 0)),
            pl.BlockSpec((1, hidden), lambda i: (0, 0)),
        ],
        out_specs=pl.BlockSpec((block_b, hidden), lambda i: (i, 0)),
        compiler_params=pltpu.CompilerParams(
            dimension_semantics=("parallel",)),
    )(x, w1c, b1_2d, w2c, b2_2d)


def _reference_forward(x, w1, b1, w2, b2):
    h = jnp.maximum(x @ w1 + b1, 0.0)
    return h @ w2 + b2


if __name__ == "__main__":
    input_dim = 36
    hidden_dim = 128

    key = jax.random.PRNGKey(0)
    kx, kw1, kb1, kw2, kb2, kx2 = jax.random.split(key, 6)

    # Deterministic parameter init (uniform, Kaiming-like bounds as nn.Linear).
    bound1 = 1.0 / (input_dim ** 0.5)
    bound2 = 1.0 / (hidden_dim ** 0.5)
    w1 = jax.random.uniform(kw1, (input_dim, hidden_dim), jnp.float32,
                            -bound1, bound1)
    b1 = jax.random.uniform(kb1, (hidden_dim,), jnp.float32, -bound1, bound1)
    w2 = jax.random.uniform(kw2, (hidden_dim, hidden_dim), jnp.float32,
                            -bound2, bound2)
    b2 = jax.random.uniform(kb2, (hidden_dim,), jnp.float32, -bound2, bound2)

    # --- Small-batch (no-grid) path, f32 output ---
    batch = 8
    x = jax.random.normal(kx, (batch, input_dim), dtype=jnp.float32)
    out = jax.block_until_ready(meta_model_forward(x, w1, b1, w2, b2))
    ref = _reference_forward(x, w1, b1, w2, b2)
    assert out.shape == (batch, hidden_dim)
    # bf16 matmul operands vs. f32 reference -> loosened tolerance.
    assert jnp.allclose(out, ref, atol=2e-2, rtol=2e-2), "small-batch mismatch"

    # --- Small-batch path, optional bf16 output (reduced-writeback mode) ---
    out_bf16 = jax.block_until_ready(
        meta_model_forward(x, w1, b1, w2, b2, out_dtype=jnp.bfloat16))
    assert out_bf16.dtype == jnp.bfloat16
    assert jnp.allclose(out_bf16.astype(jnp.float32), ref,
                        atol=5e-2, rtol=5e-2), "bf16-output mismatch"

    # --- Batch-tiled (grid) path, kept small for the demo by overriding
    #     block_b; production default is block_b=2048. ---
    batch_big = 64
    x_big = jax.random.normal(kx2, (batch_big, input_dim), dtype=jnp.float32)
    out_big = jax.block_until_ready(
        meta_model_forward(x_big, w1, b1, w2, b2, block_b=16))
    ref_big = _reference_forward(x_big, w1, b1, w2, b2)
    assert out_big.shape == (batch_big, hidden_dim)
    assert jnp.allclose(out_big, ref_big, atol=2e-2, rtol=2e-2), \
        "tiled-batch mismatch"

    print("KERNEL_OK")
</pallas_src>

<mosaic_0001>
module attributes {stable_mosaic.version = 11 : i64} {
  func.func @_meta_model_kernel(%arg0: memref<8x36xf32, #tpu.memory_space<vmem>>, %arg1: memref<36x128xbf16, #tpu.memory_space<vmem>>, %arg2: memref<1x128xf32, #tpu.memory_space<vmem>>, %arg3: memref<128x128xbf16, #tpu.memory_space<vmem>>, %arg4: memref<1x128xf32, #tpu.memory_space<vmem>>, %arg5: memref<8x128xf32, #tpu.memory_space<vmem>>) attributes {dimension_semantics = [], scalar_prefetch = 0 : i64, scratch_operands = 0 : i64, tpu.core_type = #tpu.core_type<tc>} {
    %c0 = arith.constant 0 : index
    %c0_0 = arith.constant 0 : index
    %0 = vector.load %arg0[%c0, %c0_0] : memref<8x36xf32, #tpu.memory_space<vmem>>, vector<8x36xf32>
    %1 = arith.truncf %0 : vector<8x36xf32> to vector<8x36xbf16>
    %c0_1 = arith.constant 0 : index
    %c0_2 = arith.constant 0 : index
    %2 = vector.load %arg1[%c0_1, %c0_2] : memref<36x128xbf16, #tpu.memory_space<vmem>>, vector<36x128xbf16>
    %cst = arith.constant dense<0.000000e+00> : vector<8x128xf32>
    %3 = tpu.matmul %1, %2, %cst {dimension_numbers = #tpu.dot_dimension_numbers<[1], [0], [0], [1], [0, 0, 1, 1], [], []>} : vector<8x36xbf16>, vector<36x128xbf16>, vector<8x128xf32> -> vector<8x128xf32>
    %c0_3 = arith.constant 0 : index
    %c0_4 = arith.constant 0 : index
    %4 = vector.load %arg2[%c0_3, %c0_4] : memref<1x128xf32, #tpu.memory_space<vmem>>, vector<1x128xf32>
    %5 = vector.broadcast %4 : vector<1x128xf32> to vector<8x128xf32>
    %6 = arith.addf %3, %5 : vector<8x128xf32>
    %cst_5 = arith.constant 0.000000e+00 : f32
    %7 = vector.broadcast %cst_5 : f32 to vector<8x128xf32>
    %8 = arith.maximumf %6, %7 : vector<8x128xf32>
    %9 = arith.truncf %8 : vector<8x128xf32> to vector<8x128xbf16>
    %c0_6 = arith.constant 0 : index
    %c0_7 = arith.constant 0 : index
    %10 = vector.load %arg3[%c0_6, %c0_7] : memref<128x128xbf16, #tpu.memory_space<vmem>>, vector<128x128xbf16>
    %cst_8 = arith.constant dense<0.000000e+00> : vector<8x128xf32>
    %11 = tpu.matmul %9, %10, %cst_8 {dimension_numbers = #tpu.dot_dimension_numbers<[1], [0], [0], [1], [0, 0, 1, 1], [], []>} : vector<8x128xbf16>, vector<128x128xbf16>, vector<8x128xf32> -> vector<8x128xf32>
    %c0_9 = arith.constant 0 : index
    %c0_10 = arith.constant 0 : index
    %12 = vector.load %arg4[%c0_9, %c0_10] : memref<1x128xf32, #tpu.memory_space<vmem>>, vector<1x128xf32>
    %13 = vector.broadcast %12 : vector<1x128xf32> to vector<8x128xf32>
    %14 = arith.addf %11, %13 : vector<8x128xf32>
    %c0_11 = arith.constant 0 : index
    %c0_12 = arith.constant 0 : index
    %15 = vector.load %arg5[%c0_11, %c0_12] : memref<8x128xf32, #tpu.memory_space<vmem>>, vector<8x128xf32>
    tpu.vector_store %arg5[%c0_11, %c0_12], %14 {strides = array<i32>} : memref<8x128xf32, #tpu.memory_space<vmem>>, vector<8x128xf32>,
    return
  }
}

</mosaic_0001>

<bundles_post_ra>
// kernel: meta_model_forward.1
= control target key start
LH: loop header
LB: loop body
LE: loop exit
PB: predicated region body
PF: predicated region fallthrough
CT: control target
= control target key end

     0   :  { %v320_v1 = vmov 0.0   ;;  %vm55_vm0 = vcmask 1041408   ;;  %vm321_vm1 = vmmov 0   ;;  %vm51_vm2 = vcmask 293888   ;;  %s398_s0 = inlined_call_operand.vmem [shape: f32[8,36], index: 0, kind: input, shape index: {}]   ;;  %s399_s1 = inlined_call_operand.vmem [shape: bf16[36,128], index: 1, kind: input, shape index: {}]   ;;  %s400_s2 = inlined_call_operand.vmem [shape: f32[1,128], index: 2, kind: input, shape index: {}]   ;;  %s401_s3 = inlined_call_operand.vmem [shape: bf16[128,128], index: 3, kind: input, shape index: {}]   ;;  %s402_s4 = inlined_call_operand.vmem [shape: f32[1,128], index: 4, kind: input, shape index: {}]   ;;  %s403_s5 = inlined_call_operand.hbm [shape: f32[8,128], index: 5, kind: output, shape index: {}]  }
   0x1   :  { %v287_v0 = vld [vmem:[%s399_s1 + $0x10] ss:$0 sps:$4 sm:$0x33]   ;;  %254 = vmatprep.subr.bf16.mxu0 %v320_v1  ;;  %264 = vmatprep.subr.bf16.mxu1 %v320_v1  ;;  %v288_v3 = vld [vmem:[%s399_s1 + $0x8] sm:$0xff]   ;;  %v290_v4 = vld [vmem:[%s401_s3 + $0x38] sm:$0xff]  }
   0x2   :  { %v57_v2 = vsel %vm55_vm0, %v287_v0, 0  ;;  %260 = vmatprep.mubr.msk.bf16.mxu0 %vm321_vm1, %v320_v1  ;;  %265 = vmatpush3.bf16.msra.mxu1 %v290_v4  ;;  %v291_v5 = vld [vmem:[%s401_s3 + $0x30] sm:$0xff]   ;;  %v289_v6 = vld [vmem:[%s399_s1] sm:$0xff]   ;;  %v292_v8 = vld [vmem:[%s401_s3 + $0x28] sm:$0xff]  }
   0x3   :  { %255 = vmatpush3.bf16.msra.mxu0 %v57_v2  ;;  %280 = vmatprep.mubr.msk.bf16.mxu1 %vm321_vm1, %v320_v1  ;;  %v22_v7 = vld [vmem:[%s398_s0] sm:$0xff] }
   0x4   :  { %256 = vmatprep.subr.bf16.mxu0 %v320_v1  ;;  %266 = vmatprep.subr.bf16.mxu1 %v320_v1  ;;  %v23_v9 = vpack.c.bf16 %v22_v7, %v22_v7 }
   0x6   :  { %267 = vmatpush3.bf16.msra.mxu1 %v291_v5 }
   0x7   :  { %257 = vmatpush3.bf16.msra.mxu0 %v288_v3  ;;  %268 = vmatprep.subr.bf16.mxu1 %v320_v1 }
   0x8   :  { %258 = vmatprep.subr.bf16.mxu0 %v320_v1 }
   0xb   :  { %259 = vmatpush3.bf16.msra.mxu0 %v289_v6 }
   0xc   :  { %10 = vsyncpa [#allocation3], 0  ;;  %269 = vmatpush3.bf16.msra.mxu1 %v292_v8  ;;  %v293_v10 = vld [vmem:[%s401_s3 + $0x20] sm:$0xff]   ;;  %v294_v11 = vld [vmem:[%s401_s3 + $0x18] sm:$0xff]   ;;  %s322_s19 = smov [#allocation2]  }
   0xd   :  { %270 = vmatprep.subr.bf16.mxu1 %v320_v1  ;;  %v295_v12 = vld [vmem:[%s401_s3 + $0x10] sm:$0xff]   ;;  %v296_v13 = vld [vmem:[%s401_s3 + $0x8] sm:$0xff]   ;;  %v297_v14 = vld [vmem:[%s401_s3] sm:$0xff]   ;;  %s219_s20 = sshll.u32 %s322_s19, 4  ;;  %s220_s20 = int_to_ptr.vmem [resolvable:$true] %s219_s20 }
   0xe   :  { %261 = vmatmul.mubr.msk.bf16.vlgmr.msra.gmra.mxu0 %vm51_vm2, %v23_v9  ;;  %v227_v15 = vld [vmem:[%s400_s2] ss:$0 sm:$0xff]  ;;  %s298_s2 = scalar_lea.vmem %s220_s20, 128  ;;  %p303_p1 = scmp.lt.s32.totalorder %s220_s20, %s220_s20 }
   0xf   :  { %v232_v23 = vld [vmem:[%s402_s4] ss:$0 sm:$0xff]  ;;  %p299_p0 = scmp.ne.s32.totalorder %s220_s20, %s298_s2  ;;  %p304_p2 = scmp.lt.s32.totalorder %s298_s2, %s298_s2 }
  0x10   :  { %271 = vmatpush3.bf16.msra.mxu1 %v293_v10 }
  0x11   :  { %272 = vmatprep.subr.bf16.mxu1 %v320_v1  ;;  %p305_p3 = por %p304_p2, %p303_p1 }
  0x13   :  { %p306_p4 = pnand %p305_p3, %p299_p0 }
  0x14   :  { %273 = vmatpush3.bf16.msra.mxu1 %v294_v11 }
  0x15   :  { %274 = vmatprep.subr.bf16.mxu1 %v320_v1 }
  0x18   :  { %275 = vmatpush3.bf16.msra.mxu1 %v295_v12 }
  0x19   :  { %276 = vmatprep.subr.bf16.mxu1 %v320_v1 }
  0x1c   :  { %277 = vmatpush3.bf16.msra.mxu1 %v296_v13 }
  0x1d   :  { %278 = vmatprep.subr.bf16.mxu1 %v320_v1 }
  0x20   :  { %279 = vmatpush3.bf16.msra.mxu1 %v297_v14 }
  0xce   :  { %v93_v16 = vpop.f32.mrf.mxu0 }
  0xcf   :  { %v94_v17 = vadd.f32 %v227_v15, %v93_v16 }
  0xd0   :  { %v262_v18 = vpop.f32.mrf.mxu0 }
  0xd1   :  { %v99_v19 = vmax.f32 %v94_v17, 0.0 }
  0xd2   :  { %v96_v20 = vpop.f32.mrf.mxu0 }
  0xd3   :  { %v100_v21 = vpack.c.bf16 %v99_v19, %v99_v19 }
  0xd4   :  { %v263_v22 = vpop.f32.mrf.mxu0 }
  0xd5   :  { %281 = vmatmul.mubr.bf16.vlgmr.msra.gmra.mxu1 %v100_v21 }
 0x195   :  { %v206_v24 = vpop.f32.mrf.mxu1 }
 0x196   :  { %v207_v25 = vadd.f32 %v232_v23, %v206_v24 }
 0x197   :  { %v282_v26 = vpop.f32.mrf.mxu1 }
 0x198   :  { %212 = vst [vmem:[#allocation2] sm:$0xff] %v207_v25 }
 0x199   :  { %v209_v27 = vpop.f32.mrf.mxu1 }
 0x19a   :  { %309 = shalt.err (!%p306_p4)
}
 0x19b   :  { %222 = dma.vmem_to_hbm [thread:$0]  %s220_s20, 128, %s403_s5, [#allocation3]   ;;  %v283_v28 = vpop.f32.mrf.mxu1 }
 0x19c   :  { %318 = dma.done.wait [#allocation3], 128  }
 0x19d   :  { %319 = vsyncadd [#allocation3], 4294967168 }
 0x19e   :  { %226 = vsyncpa [#allocation3], 1 }

</bundles_post_ra>
